<compile_context>
chip_gen: v6e
topology: v6e:2x2x1
jax: 0.10.0
libtpu: 0.0.40
codegen_flags: <defaults>
</compile_context>

<pallas_src>
import math
from functools import partial

import jax
import jax.numpy as jnp
from jax.experimental import pallas as pl
from jax.experimental.pallas import tpu as pltpu


def _round_up(n, m):
    return ((n + m - 1) // m) * m


def _bf16_epilogue_supported():
    """bf16 VPU/EUP is present on v6e / v7x; keep the f32 epilogue on v5e & older."""
    try:
        kind = jax.devices()[0].device_kind.lower()
    except Exception:
        return False
    return not any(tag in kind for tag in ("v2", "v3", "v4", "v5"))


def _vmem_limit_bytes(TB, D, Hp, Lp):
    """Honest scoped-VMEM budget from the actual footprint (+ slack), not a chip fraction."""
    x_tiles = 2 * TB * D * 4          # double-buffered streamed f32 x tiles
    out_tiles = 2 * TB * Lp * 2       # double-buffered streamed bf16 out tiles
    weights = 2 * (D * Hp * 2 + Hp * Lp * 2 + Hp * 4 + Lp * 4)   # resident (worst: 2 bufs)
    interm = TB * Hp * 4              # f32 hidden intermediate headroom
    total = x_tiles + out_tiles + weights + interm
    return max(2 * total + (2 << 20), 8 << 20)   # 2x slack + compiler scratch, >= 8 MiB


def _intent_classifier_kernel(x_ref, w1_ref, b1_ref, w2_ref, b2_ref, o_ref,
                              *, bf16_epilogue):
    # x:  (TB, D)  f32       w1: (D, Hp)  bf16     b1: (1, Hp) f32
    # w2: (Hp, Lp) bf16      b2: (1, Lp)  f32      o:  (TB, Lp) bf16
    x = x_ref[...].astype(jnp.bfloat16)            # cast fused into the kernel
    h = jnp.dot(x, w1_ref[...], preferred_element_type=jnp.float32)
    h = h + b1_ref[...]
    if bf16_epilogue:
        h = jnp.tanh(h.astype(jnp.bfloat16))       # bf16 VPU/EUP (v6e / v7x)
    else:
        h = jnp.tanh(h).astype(jnp.bfloat16)       # f32 EUP (v5e), cast for MXU
    # dropout -> identity (eval mode)
    out = jnp.dot(h, w2_ref[...], preferred_element_type=jnp.float32) + b2_ref[...]
    o_ref[...] = out.astype(o_ref.dtype)           # bf16 writeback (halved HBM traffic)


def prepare_params(w1, b1, w2, b2, lane=128):
    """One-time parameter prep.

    Args (PyTorch nn.Linear layout):
      w1: (2D, D), b1: (2D,), w2: (L, 2D), b2: (L,)
    Returns:
      ((w1p, b1p, w2p, b2p), L) where weights are (in, out) bf16 padded to
      lane multiples and biases are (1, out) f32 padded rows.
    """
    H, D = w1.shape          # H = 2 * D
    L = w2.shape[0]
    Hp = _round_up(H, lane)
    Lp = _round_up(L, lane)

    w1p = jnp.zeros((D, Hp), jnp.bfloat16).at[:, :H].set(w1.T.astype(jnp.bfloat16))
    b1p = jnp.zeros((1, Hp), jnp.float32).at[:, :H].set(b1.reshape(1, H))
    w2p = jnp.zeros((Hp, Lp), jnp.bfloat16).at[:H, :L].set(w2.T.astype(jnp.bfloat16))
    b2p = jnp.zeros((1, Lp), jnp.float32).at[:, :L].set(b2.reshape(1, L))
    return (w1p, b1p, w2p, b2p), L


@partial(jax.jit, static_argnums=2)
def simple_intent_classifier(x, prepared, num_labels):
    """Forward pass.

    Args:
      x:        (B, D) float32 dense features.
      prepared: output of prepare_params (weights already (in,out), padded, bf16).
      num_labels: L (unpadded number of intent labels, static).
    Returns:
      (B, L) float32 logits.
    """
    w1p, b1p, w2p, b2p = prepared
    B, D = x.shape
    Hp = w1p.shape[1]
    Lp = w2p.shape[1]

    # Batch tile: multiple of 16 sublanes (clean bf16 vreg packing), capped at
    # 512 rows, and sized so nb >= 2 when possible (v7x megacore sharding).
    TB = min(512, max(16, _round_up(pl.cdiv(B, 2), 16)))
    Bp = _round_up(B, TB)
    nb = Bp // TB

    xp = x if Bp == B else jnp.pad(x, ((0, Bp - B), (0, 0)))   # pad only if needed

    flops = 2 * Bp * D * Hp + 2 * Bp * Hp * Lp
    bytes_accessed = (Bp * D * 4 + w1p.size * 2 + w2p.size * 2
                      + b1p.size * 4 + b2p.size * 4 + Bp * Lp * 2)

    out = pl.pallas_call(
        partial(_intent_classifier_kernel,
                bf16_epilogue=_bf16_epilogue_supported()),
        out_shape=jax.ShapeDtypeStruct((Bp, Lp), jnp.bfloat16),
        grid=(nb,),
        in_specs=[
            pl.BlockSpec((TB, D), lambda i: (i, 0)),     # x: streamed per batch tile
            pl.BlockSpec((D, Hp), lambda i: (0, 0)),     # weights/biases stay
            pl.BlockSpec((1, Hp), lambda i: (0, 0)),     # VMEM-resident across
            pl.BlockSpec((Hp, Lp), lambda i: (0, 0)),    # the batch grid
            pl.BlockSpec((1, Lp), lambda i: (0, 0)),
        ],
        out_specs=pl.BlockSpec((TB, Lp), lambda i: (i, 0)),   # lane-dense bf16 stores
        compiler_params=pltpu.CompilerParams(
            dimension_semantics=("parallel",),
            vmem_limit_bytes=_vmem_limit_bytes(TB, D, Hp, Lp),
        ),
        cost_estimate=pl.CostEstimate(
            flops=flops,
            transcendentals=Bp * Hp,
            bytes_accessed=bytes_accessed,
        ),
    )(xp, w1p, b1p, w2p, b2p)

    # Tiny fused slice + upcast back to the module's f32 logits.
    return out[:B, :num_labels].astype(jnp.float32)


def init_params(key, input_dim, num_intent_labels):
    """Deterministic nn.Linear-style init: U(-1/sqrt(fan_in), 1/sqrt(fan_in))."""
    k1, k2, k3, k4 = jax.random.split(key, 4)
    hidden = input_dim * 2
    bound1 = 1.0 / math.sqrt(input_dim)
    bound2 = 1.0 / math.sqrt(hidden)
    w1 = jax.random.uniform(k1, (hidden, input_dim), jnp.float32, -bound1, bound1)
    b1 = jax.random.uniform(k2, (hidden,), jnp.float32, -bound1, bound1)
    w2 = jax.random.uniform(k3, (num_intent_labels, hidden), jnp.float32, -bound2, bound2)
    b2 = jax.random.uniform(k4, (num_intent_labels,), jnp.float32, -bound2, bound2)
    return w1, b1, w2, b2


if __name__ == "__main__":
    B = 8                 # batch
    D = 32                # input_dim
    L = 16                # num_intent_labels

    key = jax.random.PRNGKey(0)
    kx, kp = jax.random.split(key)
    x = jax.random.normal(kx, (B, D), jnp.float32)
    w1, b1, w2, b2 = init_params(kp, D, L)

    # One-time weight prep (transpose + pad + bf16 cast), then the fused call.
    prepared, num_labels = prepare_params(w1, b1, w2, b2)
    out = simple_intent_classifier(x, prepared, num_labels)
    out = jax.block_until_ready(out)

    # Pure-JAX f32 reference (dropout is identity in eval). bf16 MXU inputs,
    # bf16 epilogue/output -> loosen tolerance accordingly.
    ref = jnp.tanh(x @ w1.T + b1) @ w2.T + b2
    assert out.shape == (B, L)
    assert out.dtype == jnp.float32
    assert jnp.allclose(out, ref, atol=5e-2, rtol=5e-2), float(jnp.max(jnp.abs(out - ref)))

    print("KERNEL_OK")
</pallas_src>

<mosaic_0001>
module attributes {stable_mosaic.version = 11 : i64} {
  func.func @_intent_classifier_kernel(%arg0: i32, %arg1: memref<16x32xf32, #tpu.memory_space<vmem>>, %arg2: memref<32x128xbf16, #tpu.memory_space<vmem>>, %arg3: memref<1x128xf32, #tpu.memory_space<vmem>>, %arg4: memref<128x128xbf16, #tpu.memory_space<vmem>>, %arg5: memref<1x128xf32, #tpu.memory_space<vmem>>, %arg6: memref<16x128xbf16, #tpu.memory_space<vmem>>) attributes {dimension_semantics = [#tpu.dimension_semantics<parallel>], iteration_bounds = array<i64: 1>, scalar_prefetch = 0 : i64, scratch_operands = 0 : i64, tpu.core_type = #tpu.core_type<tc>, window_params = [{transform_indices = @transform_0, window_bounds = array<i64: 16, 32>}, {pipeline_mode = #tpu.pipeline_mode<synchronous>, transform_indices = @transform_1, window_bounds = array<i64: 32, 128>}, {pipeline_mode = #tpu.pipeline_mode<synchronous>, transform_indices = @transform_2, window_bounds = array<i64: 1, 128>}, {pipeline_mode = #tpu.pipeline_mode<synchronous>, transform_indices = @transform_3, window_bounds = array<i64: 128, 128>}, {pipeline_mode = #tpu.pipeline_mode<synchronous>, transform_indices = @transform_4, window_bounds = array<i64: 1, 128>}, {transform_indices = @transform_5, window_bounds = array<i64: 16, 128>}]} {
    %c0 = arith.constant 0 : index
    %c0_0 = arith.constant 0 : index
    %0 = vector.load %arg1[%c0, %c0_0] : memref<16x32xf32, #tpu.memory_space<vmem>>, vector<16x32xf32>
    %1 = arith.truncf %0 : vector<16x32xf32> to vector<16x32xbf16>
    %c0_1 = arith.constant 0 : index
    %c0_2 = arith.constant 0 : index
    %2 = vector.load %arg2[%c0_1, %c0_2] : memref<32x128xbf16, #tpu.memory_space<vmem>>, vector<32x128xbf16>
    %cst = arith.constant dense<0.000000e+00> : vector<16x128xf32>
    %3 = tpu.matmul %1, %2, %cst {dimension_numbers = #tpu.dot_dimension_numbers<[1], [0], [0], [1], [0, 0, 1, 1], [], []>} : vector<16x32xbf16>, vector<32x128xbf16>, vector<16x128xf32> -> vector<16x128xf32>
    %c0_3 = arith.constant 0 : index
    %c0_4 = arith.constant 0 : index
    %4 = vector.load %arg3[%c0_3, %c0_4] : memref<1x128xf32, #tpu.memory_space<vmem>>, vector<1x128xf32>
    %5 = vector.broadcast %4 : vector<1x128xf32> to vector<16x128xf32>
    %6 = arith.addf %3, %5 : vector<16x128xf32>
    %7 = arith.truncf %6 : vector<16x128xf32> to vector<16x128xbf16>
    %8 = math.tanh %7 : vector<16x128xbf16>
    %c0_5 = arith.constant 0 : index
    %c0_6 = arith.constant 0 : index
    %9 = vector.load %arg4[%c0_5, %c0_6] : memref<128x128xbf16, #tpu.memory_space<vmem>>, vector<128x128xbf16>
    %cst_7 = arith.constant dense<0.000000e+00> : vector<16x128xf32>
    %10 = tpu.matmul %8, %9, %cst_7 {dimension_numbers = #tpu.dot_dimension_numbers<[1], [0], [0], [1], [0, 0, 1, 1], [], []>} : vector<16x128xbf16>, vector<128x128xbf16>, vector<16x128xf32> -> vector<16x128xf32>
    %c0_8 = arith.constant 0 : index
    %c0_9 = arith.constant 0 : index
    %11 = vector.load %arg5[%c0_8, %c0_9] : memref<1x128xf32, #tpu.memory_space<vmem>>, vector<1x128xf32>
    %12 = vector.broadcast %11 : vector<1x128xf32> to vector<16x128xf32>
    %13 = arith.addf %10, %12 : vector<16x128xf32>
    %14 = arith.truncf %13 : vector<16x128xf32> to vector<16x128xbf16>
    %c0_10 = arith.constant 0 : index
    %c0_11 = arith.constant 0 : index
    %15 = vector.load %arg6[%c0_10, %c0_11] : memref<16x128xbf16, #tpu.memory_space<vmem>>, vector<16x128xbf16>
    tpu.vector_store %arg6[%c0_10, %c0_11], %14 {strides = array<i32>} : memref<16x128xbf16, #tpu.memory_space<vmem>>, vector<16x128xbf16>,
    return
  }
  func.func @transform_0(%arg0: i32) -> (i32, i32) {
    %c0_i32 = arith.constant 0 : i32
    %c0_i32_0 = arith.constant 0 : i32
    return %arg0, %c0_i32 : i32, i32
  }
  func.func @transform_1(%arg0: i32) -> (i32, i32) {
    %c0_i32 = arith.constant 0 : i32
    %c0_i32_0 = arith.constant 0 : i32
    %c0_i32_1 = arith.constant 0 : i32
    return %c0_i32, %c0_i32_0 : i32, i32
  }
  func.func @transform_2(%arg0: i32) -> (i32, i32) {
    %c0_i32 = arith.constant 0 : i32
    %c0_i32_0 = arith.constant 0 : i32
    %c0_i32_1 = arith.constant 0 : i32
    return %c0_i32, %c0_i32_0 : i32, i32
  }
  func.func @transform_3(%arg0: i32) -> (i32, i32) {
    %c0_i32 = arith.constant 0 : i32
    %c0_i32_0 = arith.constant 0 : i32
    %c0_i32_1 = arith.constant 0 : i32
    return %c0_i32, %c0_i32_0 : i32, i32
  }
  func.func @transform_4(%arg0: i32) -> (i32, i32) {
    %c0_i32 = arith.constant 0 : i32
    %c0_i32_0 = arith.constant 0 : i32
    %c0_i32_1 = arith.constant 0 : i32
    return %c0_i32, %c0_i32_0 : i32, i32
  }
  func.func @transform_5(%arg0: i32) -> (i32, i32) {
    %c0_i32 = arith.constant 0 : i32
    %c0_i32_0 = arith.constant 0 : i32
    return %arg0, %c0_i32 : i32, i32
  }
}

</mosaic_0001>

<bundles_post_ra>
// kernel: simple_intent_classifier.1
= control target key start
LH: loop header
LB: loop body
LE: loop exit
PB: predicated region body
PF: predicated region fallthrough
CT: control target
= control target key end

     0   :  { %10 = vsyncpa [#allocation3], 0  ;;  %s336_s18 = smov [#allocation2]   ;;  %s395_s0 = inlined_call_operand.vmem [shape: f32[16,32], index: 0, kind: input, shape index: {}]   ;;  %s396_s1 = inlined_call_operand.vmem [shape: bf16[32,128], index: 1, kind: input, shape index: {}]   ;;  %s397_s2 = inlined_call_operand.vmem [shape: f32[1,128], index: 2, kind: input, shape index: {}]   ;;  %s398_s3 = inlined_call_operand.hbm [shape: bf16[128,128], index: 3, kind: input, shape index: {}]   ;;  %s399_s4 = inlined_call_operand.vmem [shape: f32[1,128], index: 4, kind: input, shape index: {}]   ;;  %s400_s5 = inlined_call_operand.vmem [shape: bf16[16,128], index: 5, kind: output, shape index: {}]  }
   0x1   :  { %s22_s19 = sshll.u32 %s336_s18, 4  ;;  %s23_s19 = int_to_ptr.vmem [resolvable:$true] %s22_s19 }
   0x2   :  { %s322_s20 = scalar_lea.vmem %s23_s19, 1024  ;;  %p327_p1 = scmp.lt.s32.totalorder %s23_s19, %s23_s19 }
   0x3   :  { %p323_p0 = scmp.ne.s32.totalorder %s23_s19, %s322_s20  ;;  %p328_p2 = scmp.lt.s32.totalorder %s322_s20, %s322_s20 }
   0x5   :  { %p329_p3 = por %p328_p2, %p327_p1 }
   0x7   :  { %p330_p4 = pnand %p329_p3, %p323_p0 }
   0x9   :  { %333 = shalt.err (!%p330_p4)
}
   0xa   :  { %s337_s21 = smov 64   ;;  %s338_s22 = smov 4  }
   0xb   :  { %28 = dma.hbm_to_vmem [thread:$0]  %s398_s3, 1024, %s23_s19, [#allocation3], %s337_s21, %s337_s21, %s338_s22  }
   0xc   :  { %334 = dma.done.wait [#allocation3], 1024  }
   0xd   :  { %335 = vsyncadd [#allocation3], 4294966272  ;;  %v339_v0 = vmov 0.0   ;;  %vm340_vm0 = vmmov 0   ;;  %v302_v1 = vld [vmem:[%s396_s1 + $0x8] sm:$0xff]   ;;  %v303_v2 = vld [vmem:[%s396_s1] sm:$0xff]  }
   0xe   :  { %269 = vmatprep.subr.bf16.mxu0 %v339_v0  ;;  %273 = vmatprep.mubr.msk.bf16.mxu0 %vm340_vm0, %v339_v0  ;;  %v35_v3 = vld [vmem:[%s395_s0] sm:$0xff]  ;;  %v36_v4 = vld [vmem:[%s395_s0 + $0x8] sm:$0xff]  ;;  %v304_v5 = vld [vmem:[#allocation2 + $0x38] sm:$0xff]   ;;  %vm61_vm1 = vcmask 261120  }
   0xf   :  { %277 = vmatprep.subr.bf16.mxu1 %v339_v0  ;;  %293 = vmatprep.mubr.msk.bf16.mxu1 %vm340_vm0, %v339_v0  ;;  %v305_v6 = vld [vmem:[#allocation2 + $0x30] sm:$0xff]   ;;  %v37_v7 = vpack.c.bf16 %v36_v4, %v35_v3  ;;  %v306_v8 = vld [vmem:[#allocation2 + $0x28] sm:$0xff]   ;;  %v307_v9 = vld [vmem:[#allocation2 + $0x20] sm:$0xff]  }
  0x10   :  { %270 = vmatpush3.bf16.msra.mxu0 %v302_v1  ;;  %278 = vmatpush3.bf16.msra.mxu1 %v304_v5  ;;  %v308_v10 = vld [vmem:[#allocation2 + $0x18] sm:$0xff]   ;;  %v309_v11 = vld [vmem:[#allocation2 + $0x10] sm:$0xff]   ;;  %v310_v12 = vld [vmem:[#allocation2 + $0x8] sm:$0xff]  }
  0x11   :  { %271 = vmatprep.subr.bf16.mxu0 %v339_v0  ;;  %279 = vmatprep.subr.bf16.mxu1 %v339_v0  ;;  %v311_v13 = vld [vmem:[#allocation2] sm:$0xff]  }
  0x12   :  { %v235_v15 = vld [vmem:[%s397_s2] ss:$0 sm:$0xff] }
  0x13   :  { %v239_v24 = vld [vmem:[%s399_s4] ss:$0 sm:$0xff] }
  0x14   :  { %272 = vmatpush3.bf16.msra.mxu0 %v303_v2  ;;  %280 = vmatpush3.bf16.msra.mxu1 %v305_v6 }
  0x15   :  { %281 = vmatprep.subr.bf16.mxu1 %v339_v0 }
  0x17   :  { %274 = vmatmul.mubr.msk.bf16.vlgmr.msra.gmra.mxu0 %vm61_vm1, %v37_v7 }
  0x18   :  { %282 = vmatpush3.bf16.msra.mxu1 %v306_v8 }
  0x19   :  { %283 = vmatprep.subr.bf16.mxu1 %v339_v0 }
  0x1c   :  { %284 = vmatpush3.bf16.msra.mxu1 %v307_v9 }
  0x1d   :  { %285 = vmatprep.subr.bf16.mxu1 %v339_v0 }
  0x20   :  { %286 = vmatpush3.bf16.msra.mxu1 %v308_v10 }
  0x21   :  { %287 = vmatprep.subr.bf16.mxu1 %v339_v0 }
  0x24   :  { %288 = vmatpush3.bf16.msra.mxu1 %v309_v11 }
  0x25   :  { %289 = vmatprep.subr.bf16.mxu1 %v339_v0 }
  0x28   :  { %290 = vmatpush3.bf16.msra.mxu1 %v310_v12 }
  0x29   :  { %291 = vmatprep.subr.bf16.mxu1 %v339_v0 }
  0x2c   :  { %292 = vmatpush3.bf16.msra.mxu1 %v311_v13 }
  0xd7   :  { %v99_v14 = vpop.f32.mrf.mxu0 }
  0xd8   :  { %v100_v18 = vadd.f32 %v235_v15, %v99_v14 }
  0xd9   :  { %v275_v16 = vpop.f32.mrf.mxu0 }
  0xdb   :  { %v102_v17 = vpop.f32.mrf.mxu0 }
  0xdc   :  { %v103_v19 = vadd.f32 %v235_v15, %v102_v17 }
  0xdd   :  { %v276_v20 = vpop.f32.mrf.mxu0 }
  0xde   :  { %v106_v21 = vpack.c.bf16 %v103_v19, %v100_v18 }
  0xe0   :  { %312 = vtanh.bf16 %v106_v21 }
  0xee   :  { %v313_v22 = vpop.eup %312 }
  0xef   :  { %294 = vmatmul.mubr.bf16.vlgmr.msra.gmra.mxu1 %v313_v22 }
 0x1af   :  { %v213_v23 = vpop.f32.mrf.mxu1 }
 0x1b0   :  { %v214_v27 = vadd.f32 %v239_v24, %v213_v23 }
 0x1b1   :  { %v295_v25 = vpop.f32.mrf.mxu1 }
 0x1b3   :  { %v216_v26 = vpop.f32.mrf.mxu1 }
 0x1b4   :  { %v217_v28 = vadd.f32 %v239_v24, %v216_v26 }
 0x1b5   :  { %v296_v29 = vpop.f32.mrf.mxu1 }
 0x1b6   :  { %v255_v30 = vpack.c.bf16 %v217_v28, %v214_v27 }
 0x1b8   :  { %256 = vst [vmem:[%s400_s5] sm:$0xff] %v255_v30  }
 0x1b9   :  { %234 = vsyncpa [#allocation3], 1 }

</bundles_post_ra>
